<compile_context>
chip_gen: v5e
topology: v5e:2x2
jax: 0.10.0
libtpu: 0.0.40
codegen_flags: <defaults>
</compile_context>

<pallas_src>
import functools

import jax
import jax.numpy as jnp
from jax.experimental import pallas as pl
from jax.experimental.pallas import tpu as pltpu

HIDDEN = 256
OUT_LANES = 128  # lane-dense output slab width (q1 -> lane 0, q2 -> lane 1)


def critic_kernel(x_ref,
                  w14_ref, b14_ref,
                  w2_ref, b2_ref, w5_ref, b5_ref,
                  w3p_ref, w6p_ref, b36_ref,
                  out_ref):
    """Both Q heads in one invocation; all weights VMEM-resident, bf16 dots."""
    # ---- layer 1, both heads fused: single K=(S+A) bf16 dot -> (tb, 512) f32
    x = x_ref[...].astype(jnp.bfloat16)
    hg = jnp.dot(x, w14_ref[...], preferred_element_type=jnp.float32)
    hg = jnp.maximum(hg + b14_ref[...], 0.0)

    # Split at the 256-lane boundary (128-lane tile aligned -> no VMEM copy).
    h1 = hg[:, :HIDDEN].astype(jnp.bfloat16)   # Q1 hidden
    g1 = hg[:, HIDDEN:].astype(jnp.bfloat16)   # Q2 hidden

    # ---- layer 2, two separate 256x256 bf16 dots (block-diag would double
    #      MXU tile passes) ----
    h2 = jnp.maximum(
        jnp.dot(h1, w2_ref[...], preferred_element_type=jnp.float32) + b2_ref[...], 0.0)
    g2 = jnp.maximum(
        jnp.dot(g1, w5_ref[...], preferred_element_type=jnp.float32) + b5_ref[...], 0.0)

    # ---- layer 3, packed lane-dense output (tb, OUT_LANES) ----
    q = jnp.dot(h2.astype(jnp.bfloat16), w3p_ref[...],
                preferred_element_type=jnp.float32)
    q = q + jnp.dot(g2.astype(jnp.bfloat16), w6p_ref[...],
                    preferred_element_type=jnp.float32)
    out_ref[...] = q + b36_ref[...]


def pack_critic_params(p):
    """Repack torch-style f32 params into the fused bf16 kernel layout."""
    hid = HIDDEN
    # Layer 1 of both heads stacked along out dim: (S+A, 2*hid), bf16.
    w14 = jnp.concatenate([p["w1"], p["w4"]], axis=1).astype(jnp.bfloat16)
    b14 = jnp.concatenate([p["b1"], p["b4"]], axis=1)              # f32 (1, 2*hid)
    # Layer 3: zero-padded to a lane-dense OUT_LANES-wide slab, bf16.
    w3p = (jnp.zeros((hid, OUT_LANES), jnp.float32)
           .at[:, 0:1].set(p["w3"])).astype(jnp.bfloat16)
    w6p = (jnp.zeros((hid, OUT_LANES), jnp.float32)
           .at[:, 1:2].set(p["w6"])).astype(jnp.bfloat16)
    b36 = (jnp.zeros((1, OUT_LANES), jnp.float32)
           .at[:, 0:1].set(p["b3"]).at[:, 1:2].set(p["b6"]))       # f32
    return {
        "w14": w14, "b14": b14,
        "w2": p["w2"].astype(jnp.bfloat16), "b2": p["b2"],
        "w5": p["w5"].astype(jnp.bfloat16), "b5": p["b5"],
        "w3p": w3p, "w6p": w6p, "b36": b36,
    }


def _pick_tile(B, max_tile_b, min_split_b):
    """Batch tile: single exact tile for small B; >=2 tiles (v7x megacore),
    multiple of 8, dividing B for common power-of-two batches otherwise."""
    if B <= min_split_b:
        return B
    n_tiles = max(2, pl.cdiv(B, max_tile_b))
    tb = pl.cdiv(B, n_tiles)
    tb = pl.cdiv(tb, 8) * 8
    return tb


def critic_forward(state, action, packed, *, max_tile_b=1024, min_split_b=256):
    """Pallas wrapper. state: (B, S), action: (B, A) float32 -> (q1, q2)."""
    B, S = state.shape
    A = action.shape[1]
    in_dim = S + A
    hid = HIDDEN

    # Fuse layer-1 K dim: one tiny HBM concat instead of two in-kernel dots.
    x = jnp.concatenate([state, action], axis=1)                   # (B, S+A) f32

    tb = _pick_tile(B, max_tile_b, min_split_b)
    pad = (-B) % tb
    if pad:  # only for awkward batch sizes; common batches divide exactly
        x = jnp.pad(x, ((0, pad), (0, 0)))
    Bp = B + pad
    grid = (Bp // tb,)

    def batch_map(i):
        return (i, 0)

    def resident_map(i):
        return (0, 0)

    w = packed
    weight_args = (w["w14"], w["b14"],
                   w["w2"], w["b2"], w["w5"], w["b5"],
                   w["w3p"], w["w6p"], w["b36"])
    weight_specs = [pl.BlockSpec(a.shape, resident_map) for a in weight_args]

    # Honest scheduler hint: padded batch, only the 2 real output lanes.
    flops = 2 * Bp * (in_dim * 2 * hid + 2 * hid * hid + 2 * hid * 2)
    weight_bytes = sum(int(a.size) * a.dtype.itemsize for a in weight_args)
    bytes_accessed = weight_bytes + Bp * (in_dim + OUT_LANES) * 4

    out = pl.pallas_call(
        critic_kernel,
        out_shape=jax.ShapeDtypeStruct((Bp, OUT_LANES), jnp.float32),
        grid=grid,
        in_specs=[pl.BlockSpec((tb, in_dim), batch_map)] + weight_specs,
        out_specs=pl.BlockSpec((tb, OUT_LANES), batch_map),
        compiler_params=pltpu.CompilerParams(
            dimension_semantics=("parallel",)),
        cost_estimate=pl.CostEstimate(
            flops=flops, transcendentals=0, bytes_accessed=bytes_accessed),
    )(x, *weight_args)

    q1 = out[:B, 0:1]
    q2 = out[:B, 1:2]
    return q1, q2


def init_critic_params(key, state_dim, action_dim, hidden=HIDDEN):
    """Deterministic PyTorch-style init. Weights stored transposed (in, out)."""
    in_dim = state_dim + action_dim

    def linear(k, fan_in, fan_out):
        kw, kb = jax.random.split(k)
        bound = 1.0 / jnp.sqrt(jnp.float32(fan_in))
        wgt = jax.random.uniform(kw, (fan_in, fan_out), jnp.float32, -bound, bound)
        bias = jax.random.uniform(kb, (1, fan_out), jnp.float32, -bound, bound)
        return wgt, bias

    keys = jax.random.split(key, 6)
    p = {}
    p["w1"], p["b1"] = linear(keys[0], in_dim, hidden)
    p["w2"], p["b2"] = linear(keys[1], hidden, hidden)
    p["w3"], p["b3"] = linear(keys[2], hidden, 1)
    p["w4"], p["b4"] = linear(keys[3], in_dim, hidden)
    p["w5"], p["b5"] = linear(keys[4], hidden, hidden)
    p["w6"], p["b6"] = linear(keys[5], hidden, 1)
    return p


def critic_forward_ref(state, action, p):
    """Pure-JAX f32 reference mirroring the PyTorch forward."""
    x = jnp.concatenate([state, action], axis=1)
    h = jnp.maximum(x @ p["w1"] + p["b1"], 0.0)
    h = jnp.maximum(h @ p["w2"] + p["b2"], 0.0)
    q1 = h @ p["w3"] + p["b3"]
    g = jnp.maximum(x @ p["w4"] + p["b4"], 0.0)
    g = jnp.maximum(g @ p["w5"] + p["b5"], 0.0)
    q2 = g @ p["w6"] + p["b6"]
    return q1, q2


if __name__ == "__main__":
    key = jax.random.PRNGKey(0)
    k_params, k_state, k_action, k_state2, k_action2 = jax.random.split(key, 5)

    state_dim, action_dim = 17, 6
    params = init_critic_params(k_params, state_dim, action_dim)
    packed = pack_critic_params(params)

    fwd = jax.jit(functools.partial(critic_forward, max_tile_b=1024,
                                    min_split_b=256))

    # bf16 MXU inputs with f32 accumulation -> loosened tolerance vs f32 ref.
    TOL = 3e-2

    # Small-batch (inference-style) path: single tile, grid=(1,).
    batch = 8
    state = jax.random.normal(k_state, (batch, state_dim), jnp.float32)
    action = jax.random.normal(k_action, (batch, action_dim), jnp.float32)
    q1, q2 = fwd(state, action, packed)
    jax.block_until_ready((q1, q2))
    q1_ref, q2_ref = critic_forward_ref(state, action, params)
    assert q1.shape == (batch, 1) and q2.shape == (batch, 1)
    assert jnp.allclose(q1, q1_ref, atol=TOL, rtol=TOL)
    assert jnp.allclose(q2, q2_ref, atol=TOL, rtol=TOL)

    # Training-sized batch: exercises the multi-tile (>=2 grid steps) path.
    batch2 = 384
    state2 = jax.random.normal(k_state2, (batch2, state_dim), jnp.float32)
    action2 = jax.random.normal(k_action2, (batch2, action_dim), jnp.float32)
    q1b, q2b = fwd(state2, action2, packed)
    jax.block_until_ready((q1b, q2b))
    q1b_ref, q2b_ref = critic_forward_ref(state2, action2, params)
    assert q1b.shape == (batch2, 1) and q2b.shape == (batch2, 1)
    assert jnp.allclose(q1b, q1b_ref, atol=TOL, rtol=TOL)
    assert jnp.allclose(q2b, q2b_ref, atol=TOL, rtol=TOL)

    print("KERNEL_OK")
</pallas_src>

<mosaic_0001>
module attributes {stable_mosaic.version = 11 : i64} {
  func.func @critic_kernel(%arg0: i32, %arg1: memref<8x23xf32, #tpu.memory_space<vmem>>, %arg2: memref<23x512xbf16, #tpu.memory_space<vmem>>, %arg3: memref<1x512xf32, #tpu.memory_space<vmem>>, %arg4: memref<256x256xbf16, #tpu.memory_space<vmem>>, %arg5: memref<1x256xf32, #tpu.memory_space<vmem>>, %arg6: memref<256x256xbf16, #tpu.memory_space<vmem>>, %arg7: memref<1x256xf32, #tpu.memory_space<vmem>>, %arg8: memref<256x128xbf16, #tpu.memory_space<vmem>>, %arg9: memref<256x128xbf16, #tpu.memory_space<vmem>>, %arg10: memref<1x128xf32, #tpu.memory_space<vmem>>, %arg11: memref<8x128xf32, #tpu.memory_space<vmem>>) attributes {dimension_semantics = [#tpu.dimension_semantics<parallel>], iteration_bounds = array<i64: 1>, scalar_prefetch = 0 : i64, scratch_operands = 0 : i64, tpu.core_type = #tpu.core_type<tc>, window_params = [{transform_indices = @transform_0, window_bounds = array<i64: 8, 23>}, {pipeline_mode = #tpu.pipeline_mode<synchronous>, transform_indices = @transform_1, window_bounds = array<i64: 23, 512>}, {pipeline_mode = #tpu.pipeline_mode<synchronous>, transform_indices = @transform_2, window_bounds = array<i64: 1, 512>}, {pipeline_mode = #tpu.pipeline_mode<synchronous>, transform_indices = @transform_3, window_bounds = array<i64: 256, 256>}, {pipeline_mode = #tpu.pipeline_mode<synchronous>, transform_indices = @transform_4, window_bounds = array<i64: 1, 256>}, {pipeline_mode = #tpu.pipeline_mode<synchronous>, transform_indices = @transform_5, window_bounds = array<i64: 256, 256>}, {pipeline_mode = #tpu.pipeline_mode<synchronous>, transform_indices = @transform_6, window_bounds = array<i64: 1, 256>}, {pipeline_mode = #tpu.pipeline_mode<synchronous>, transform_indices = @transform_7, window_bounds = array<i64: 256, 128>}, {pipeline_mode = #tpu.pipeline_mode<synchronous>, transform_indices = @transform_8, window_bounds = array<i64: 256, 128>}, {pipeline_mode = #tpu.pipeline_mode<synchronous>, transform_indices = @transform_9, window_bounds = array<i64: 1, 128>}, {transform_indices = @transform_10, window_bounds = array<i64: 8, 128>}]} {
    %c0 = arith.constant 0 : index
    %c0_0 = arith.constant 0 : index
    %0 = vector.load %arg1[%c0, %c0_0] : memref<8x23xf32, #tpu.memory_space<vmem>>, vector<8x23xf32>
    %1 = arith.truncf %0 : vector<8x23xf32> to vector<8x23xbf16>
    %c0_1 = arith.constant 0 : index
    %c0_2 = arith.constant 0 : index
    %2 = vector.load %arg2[%c0_1, %c0_2] : memref<23x512xbf16, #tpu.memory_space<vmem>>, vector<23x512xbf16>
    %cst = arith.constant dense<0.000000e+00> : vector<8x512xf32>
    %3 = tpu.matmul %1, %2, %cst {dimension_numbers = #tpu.dot_dimension_numbers<[1], [0], [0], [1], [0, 0, 1, 1], [], []>} : vector<8x23xbf16>, vector<23x512xbf16>, vector<8x512xf32> -> vector<8x512xf32>
    %c0_3 = arith.constant 0 : index
    %c0_4 = arith.constant 0 : index
    %4 = vector.load %arg3[%c0_3, %c0_4] : memref<1x512xf32, #tpu.memory_space<vmem>>, vector<1x512xf32>
    %5 = vector.broadcast %4 : vector<1x512xf32> to vector<8x512xf32>
    %6 = arith.addf %3, %5 : vector<8x512xf32>
    %cst_5 = arith.constant 0.000000e+00 : f32
    %7 = vector.broadcast %cst_5 : f32 to vector<8x512xf32>
    %8 = arith.maximumf %6, %7 : vector<8x512xf32>
    %9 = vector.extract_strided_slice %8 {offsets = [0, 0], sizes = [8, 256], strides = [1, 1]} : vector<8x512xf32> to vector<8x256xf32>
    %10 = arith.truncf %9 : vector<8x256xf32> to vector<8x256xbf16>
    %11 = vector.extract_strided_slice %8 {offsets = [0, 256], sizes = [8, 256], strides = [1, 1]} : vector<8x512xf32> to vector<8x256xf32>
    %12 = arith.truncf %11 : vector<8x256xf32> to vector<8x256xbf16>
    %c0_6 = arith.constant 0 : index
    %c0_7 = arith.constant 0 : index
    %13 = vector.load %arg4[%c0_6, %c0_7] : memref<256x256xbf16, #tpu.memory_space<vmem>>, vector<256x256xbf16>
    %cst_8 = arith.constant dense<0.000000e+00> : vector<8x256xf32>
    %14 = tpu.matmul %10, %13, %cst_8 {dimension_numbers = #tpu.dot_dimension_numbers<[1], [0], [0], [1], [0, 0, 1, 1], [], []>} : vector<8x256xbf16>, vector<256x256xbf16>, vector<8x256xf32> -> vector<8x256xf32>
    %c0_9 = arith.constant 0 : index
    %c0_10 = arith.constant 0 : index
    %15 = vector.load %arg5[%c0_9, %c0_10] : memref<1x256xf32, #tpu.memory_space<vmem>>, vector<1x256xf32>
    %16 = vector.broadcast %15 : vector<1x256xf32> to vector<8x256xf32>
    %17 = arith.addf %14, %16 : vector<8x256xf32>
    %cst_11 = arith.constant 0.000000e+00 : f32
    %18 = vector.broadcast %cst_11 : f32 to vector<8x256xf32>
    %19 = arith.maximumf %17, %18 : vector<8x256xf32>
    %c0_12 = arith.constant 0 : index
    %c0_13 = arith.constant 0 : index
    %20 = vector.load %arg6[%c0_12, %c0_13] : memref<256x256xbf16, #tpu.memory_space<vmem>>, vector<256x256xbf16>
    %cst_14 = arith.constant dense<0.000000e+00> : vector<8x256xf32>
    %21 = tpu.matmul %12, %20, %cst_14 {dimension_numbers = #tpu.dot_dimension_numbers<[1], [0], [0], [1], [0, 0, 1, 1], [], []>} : vector<8x256xbf16>, vector<256x256xbf16>, vector<8x256xf32> -> vector<8x256xf32>
    %c0_15 = arith.constant 0 : index
    %c0_16 = arith.constant 0 : index
    %22 = vector.load %arg7[%c0_15, %c0_16] : memref<1x256xf32, #tpu.memory_space<vmem>>, vector<1x256xf32>
    %23 = vector.broadcast %22 : vector<1x256xf32> to vector<8x256xf32>
    %24 = arith.addf %21, %23 : vector<8x256xf32>
    %cst_17 = arith.constant 0.000000e+00 : f32
    %25 = vector.broadcast %cst_17 : f32 to vector<8x256xf32>
    %26 = arith.maximumf %24, %25 : vector<8x256xf32>
    %27 = arith.truncf %19 : vector<8x256xf32> to vector<8x256xbf16>
    %c0_18 = arith.constant 0 : index
    %c0_19 = arith.constant 0 : index
    %28 = vector.load %arg8[%c0_18, %c0_19] : memref<256x128xbf16, #tpu.memory_space<vmem>>, vector<256x128xbf16>
    %cst_20 = arith.constant dense<0.000000e+00> : vector<8x128xf32>
    %29 = tpu.matmul %27, %28, %cst_20 {dimension_numbers = #tpu.dot_dimension_numbers<[1], [0], [0], [1], [0, 0, 1, 1], [], []>} : vector<8x256xbf16>, vector<256x128xbf16>, vector<8x128xf32> -> vector<8x128xf32>
    %30 = arith.truncf %26 : vector<8x256xf32> to vector<8x256xbf16>
    %c0_21 = arith.constant 0 : index
    %c0_22 = arith.constant 0 : index
    %31 = vector.load %arg9[%c0_21, %c0_22] : memref<256x128xbf16, #tpu.memory_space<vmem>>, vector<256x128xbf16>
    %cst_23 = arith.constant dense<0.000000e+00> : vector<8x128xf32>
    %32 = tpu.matmul %30, %31, %cst_23 {dimension_numbers = #tpu.dot_dimension_numbers<[1], [0], [0], [1], [0, 0, 1, 1], [], []>} : vector<8x256xbf16>, vector<256x128xbf16>, vector<8x128xf32> -> vector<8x128xf32>
    %33 = arith.addf %29, %32 : vector<8x128xf32>
    %c0_24 = arith.constant 0 : index
    %c0_25 = arith.constant 0 : index
    %34 = vector.load %arg10[%c0_24, %c0_25] : memref<1x128xf32, #tpu.memory_space<vmem>>, vector<1x128xf32>
    %35 = vector.broadcast %34 : vector<1x128xf32> to vector<8x128xf32>
    %36 = arith.addf %33, %35 : vector<8x128xf32>
    %c0_26 = arith.constant 0 : index
    %c0_27 = arith.constant 0 : index
    %37 = vector.load %arg11[%c0_26, %c0_27] : memref<8x128xf32, #tpu.memory_space<vmem>>, vector<8x128xf32>
    tpu.vector_store %arg11[%c0_26, %c0_27], %36 {strides = array<i32>} : memref<8x128xf32, #tpu.memory_space<vmem>>, vector<8x128xf32>,
    return
  }
  func.func @transform_0(%arg0: i32) -> (i32, i32) {
    %c0_i32 = arith.constant 0 : i32
    %c0_i32_0 = arith.constant 0 : i32
    return %arg0, %c0_i32 : i32, i32
  }
  func.func @transform_1(%arg0: i32) -> (i32, i32) {
    %c0_i32 = arith.constant 0 : i32
    %c0_i32_0 = arith.constant 0 : i32
    %c0_i32_1 = arith.constant 0 : i32
    return %c0_i32, %c0_i32_0 : i32, i32
  }
  func.func @transform_2(%arg0: i32) -> (i32, i32) {
    %c0_i32 = arith.constant 0 : i32
    %c0_i32_0 = arith.constant 0 : i32
    %c0_i32_1 = arith.constant 0 : i32
    return %c0_i32, %c0_i32_0 : i32, i32
  }
  func.func @transform_3(%arg0: i32) -> (i32, i32) {
    %c0_i32 = arith.constant 0 : i32
    %c0_i32_0 = arith.constant 0 : i32
    %c0_i32_1 = arith.constant 0 : i32
    return %c0_i32, %c0_i32_0 : i32, i32
  }
  func.func @transform_4(%arg0: i32) -> (i32, i32) {
    %c0_i32 = arith.constant 0 : i32
    %c0_i32_0 = arith.constant 0 : i32
    %c0_i32_1 = arith.constant 0 : i32
    return %c0_i32, %c0_i32_0 : i32, i32
  }
  func.func @transform_5(%arg0: i32) -> (i32, i32) {
    %c0_i32 = arith.constant 0 : i32
    %c0_i32_0 = arith.constant 0 : i32
    %c0_i32_1 = arith.constant 0 : i32
    return %c0_i32, %c0_i32_0 : i32, i32
  }
  func.func @transform_6(%arg0: i32) -> (i32, i32) {
    %c0_i32 = arith.constant 0 : i32
    %c0_i32_0 = arith.constant 0 : i32
    %c0_i32_1 = arith.constant 0 : i32
    return %c0_i32, %c0_i32_0 : i32, i32
  }
  func.func @transform_7(%arg0: i32) -> (i32, i32) {
    %c0_i32 = arith.constant 0 : i32
    %c0_i32_0 = arith.constant 0 : i32
    %c0_i32_1 = arith.constant 0 : i32
    return %c0_i32, %c0_i32_0 : i32, i32
  }
  func.func @transform_8(%arg0: i32) -> (i32, i32) {
    %c0_i32 = arith.constant 0 : i32
    %c0_i32_0 = arith.constant 0 : i32
    %c0_i32_1 = arith.constant 0 : i32
    return %c0_i32, %c0_i32_0 : i32, i32
  }
  func.func @transform_9(%arg0: i32) -> (i32, i32) {
    %c0_i32 = arith.constant 0 : i32
    %c0_i32_0 = arith.constant 0 : i32
    %c0_i32_1 = arith.constant 0 : i32
    return %c0_i32, %c0_i32_0 : i32, i32
  }
  func.func @transform_10(%arg0: i32) -> (i32, i32) {
    %c0_i32 = arith.constant 0 : i32
    %c0_i32_0 = arith.constant 0 : i32
    return %arg0, %c0_i32 : i32, i32
  }
}

</mosaic_0001>

<bundles_post_ra>
// kernel: critic_forward.1
= control target key start
LH: loop header
LB: loop body
LE: loop exit
PB: predicated region body
PF: predicated region fallthrough
CT: control target
= control target key end

     0   :  { %15 = vsyncpa [#allocation3], 0  ;;  %s1818_s0 = inlined_call_operand.vmem [shape: f32[8,23], index: 0, kind: input, shape index: {}]   ;;  %s1819_s1 = inlined_call_operand.hbm [shape: bf16[23,512], index: 1, kind: input, shape index: {}]   ;;  %s1820_s2 = inlined_call_operand.vmem [shape: f32[1,512], index: 2, kind: input, shape index: {}]   ;;  %s1821_s3 = inlined_call_operand.hbm [shape: bf16[256,256], index: 3, kind: input, shape index: {}]   ;;  %s1822_s4 = inlined_call_operand.vmem [shape: f32[1,256], index: 4, kind: input, shape index: {}]   ;;  %s1823_s5 = inlined_call_operand.hbm [shape: bf16[256,256], index: 5, kind: input, shape index: {}]   ;;  %s1824_s6 = inlined_call_operand.vmem [shape: f32[1,256], index: 6, kind: input, shape index: {}]   ;;  %s1825_s7 = inlined_call_operand.hbm [shape: bf16[256,128], index: 7, kind: input, shape index: {}]   ;;  %s1826_s8 = inlined_call_operand.hbm [shape: bf16[256,128], index: 8, kind: input, shape index: {}]   ;;  %s1827_s9 = inlined_call_operand.vmem [shape: f32[1,128], index: 9, kind: input, shape index: {}]   ;;  %s1828_s10 = inlined_call_operand.vmem [shape: f32[8,128], index: 10, kind: output, shape index: {}]  }
   0x1   :  { %16 = vsyncpa [#allocation5], 0  ;;  %s39_s15 = sshll.u32 %s1821_s3, 4  ;;  %s40_s15 = int_to_ptr.hbm [resolvable:$true] %s39_s15 }
   0x2   :  { %17 = vsyncpa [#allocation8], 0  ;;  %s1714_s16 = smov [#allocation4]   ;;  %s69_s20 = sshll.u32 %s1825_s7, 4  ;;  %s70_s20 = int_to_ptr.hbm [resolvable:$true] %s69_s20 }
   0x3   :  { %s41_s17 = sshll.u32 %s1714_s16, 4  ;;  %s1715_s21 = smov 128   ;;  %s42_s17 = int_to_ptr.vmem [resolvable:$true] %s41_s17 }
   0x4   :  { %s1716_s22 = smov 8   ;;  %s1717_s23 = smov [#allocation7]  }
   0x5   :  { %47 = dma.hbm_to_vmem [thread:$0]  %s40_s15, 4096, %s42_s17, [#allocation5], %s1715_s21, %s1715_s21, %s1716_s22  }
   0x6   :  { %s71_s24 = sshll.u32 %s1717_s23, 4  ;;  %s1718_s25 = smov 64   ;;  %s72_s24 = int_to_ptr.vmem [resolvable:$true] %s71_s24 }
   0x7   :  { %s1719_s26 = smov 4   ;;  %s24_s28 = sshll.u32 %s1819_s1, 4  ;;  %s25_s28 = int_to_ptr.hbm [resolvable:$true] %s24_s28 }
   0x8   :  { %77 = dma.hbm_to_vmem [thread:$0]  %s70_s20, 2048, %s72_s24, [#allocation8], %s1718_s25, %s1718_s25, %s1719_s26  }
   0x9   :  { %s1720_s29 = smov [#allocation2]   ;;  %s54_s12 = sshll.u32 %s1823_s5, 4  ;;  %s55_s12 = int_to_ptr.hbm [resolvable:$true] %s54_s12 }
   0xa   :  { %s26_s30 = sshll.u32 %s1720_s29, 4  ;;  %s1721_s13 = smov 256   ;;  %s27_s30 = int_to_ptr.vmem [resolvable:$true] %s26_s30 }
   0xb   :  { %s1722_s14 = smov 16   ;;  %s1723_s15 = smov [#allocation6]  }
   0xc   :  { %32 = dma.hbm_to_vmem [thread:$0]  %s25_s28, 768, %s27_s30, [#allocation3], %s1721_s13, %s1721_s13, %s1722_s14  }
   0xd   :  { %s56_s16 = sshll.u32 %s1723_s15, 4  ;;  %s82_s19 = sshll.u32 %s1826_s8, 4  ;;  %s57_s16 = int_to_ptr.vmem [resolvable:$true] %s56_s16  ;;  %s83_s19 = int_to_ptr.hbm [resolvable:$true] %s82_s19 }
   0xe   :  { %62 = dma.hbm_to_vmem [thread:$0]  %s55_s12, 4096, %s57_s16, [#allocation5], %s1715_s21, %s1715_s21, %s1716_s22  }
   0xf   :  { %s1724_s1 = smov [#allocation9]  }
  0x10   :  { %s84_s20 = sshll.u32 %s1724_s1, 4  ;;  %s85_s20 = int_to_ptr.vmem [resolvable:$true] %s84_s20 }
  0x11   :  { %90 = dma.hbm_to_vmem [thread:$0]  %s83_s19, 2048, %s85_s20, [#allocation8], %s1718_s25, %s1718_s25, %s1719_s26  }
  0x12   :  { %1708 = dma.done.wait [#allocation3], 768  }
  0x13   :  { %1709 = vsyncadd [#allocation3], 4294966528 }
  0x14   :  { %1710 = dma.done.wait [#allocation5], 8192  }
  0x15   :  { %1711 = vsyncadd [#allocation5], 4294959104 }
  0x16   :  { %1712 = dma.done.wait [#allocation8], 4096  }
  0x17   :  { %1713 = vsyncadd [#allocation8], 4294963200  ;;  %vm166_vm0 = vcmask 1042432   ;;  %vm167_vm1 = vcmask 1043456   ;;  %v1725_v0 = vmov 65535   ;;  %v120_v2 = vld [vmem:[#allocation2 + $0x20] sm:$0xff] }
  0x18   :  { %v168_v1 = vsel %vm166_vm0, 4294967295, %v1725_v0  ;;  %v121_v3 = vld [vmem:[#allocation2 + $0x28] sm:$0xff]  ;;  %v146_v4 = vunpack.c.l.b16 %v120_v2  ;;  %v147_v5 = vunpack.c.h.b16 %v120_v2  ;;  %v1073_v12 = vld [vmem:[#allocation2] sm:$0xf]  ;;  %v1477_v13 = vld [vmem:[#allocation2 + $0xc] sm:$0xf0] }
  0x19   :  { %v148_v6 = vunpack.c.l.b16 %v121_v3  ;;  %v149_v7 = vunpack.c.h.b16 %v121_v3  ;;  %v169_v8 = vsel %vm167_vm1, %v168_v1, 0  ;;  %v1475_v14 = vld [vmem:[#allocation2 + $0x4] sm:$0xf]  ;;  %v1075_v16 = vld [vmem:[#allocation2 + $0x10] sm:$0xf0]  ;;  %v1074_v29 = vor.u32 %v1477_v13, %v1073_v12 }
  0x1a   :  { %v154_v9 = vpack.c.b16 %v146_v4, %v146_v4  ;;  %v155_v10 = vpack.c.b16 %v147_v5, %v147_v5  ;;  %v1081_v17 = vld [vmem:[#allocation2 + $0x8] sm:$0xf]  ;;  %v1478_v18 = vld [vmem:[#allocation2 + $0x14] sm:$0xf0]  ;;  %v1476_v23 = vld [vmem:[#allocation2 + $0xc] sm:$0xf]  ;;  %v1078_v30 = vor.u32 %v1475_v14, %v1075_v16 }
  0x1b   :  { %v156_v11 = vpack.c.b16 %v148_v6, %v148_v6  ;;  %v157_v15 = vpack.c.b16 %v149_v7, %v149_v7  ;;  %v1083_v24 = vld [vmem:[#allocation2 + $0x18] sm:$0xf0]  ;;  %v1149_v25 = vld [vmem:[#allocation4 + $0x70] sm:$0xf]  ;;  %v1494_v26 = vld [vmem:[#allocation4 + $0x74] sm:$0xf0]  ;;  %v1082_v32 = vor.u32 %v1478_v18, %v1081_v17 }
  0x1c   :  { %v171_v19 = vand.u32 %v169_v8, %v154_v9  ;;  %v174_v20 = vand.u32 %v169_v8, %v155_v10  ;;  %v1213_v27 = vld [vmem:[#allocation4 + $0xf0] sm:$0xf]  ;;  %v1510_v28 = vld [vmem:[#allocation4 + $0xf4] sm:$0xf0]  ;;  %v1086_v33 = vor.u32 %v1476_v23, %v1083_v24  ;;  %v1493_v34 = vld [vmem:[#allocation4 + $0x74] sm:$0xf]  ;;  %v1150_v36 = vor.u32 %v1494_v26, %v1149_v25 }
  0x1d   :  { %v177_v21 = vand.u32 %v169_v8, %v156_v11  ;;  %v180_v22 = vand.u32 %v169_v8, %v157_v15  ;;  %v114_v31 = vld [vmem:[%s1818_s0] sm:$0xff]  ;;  %v1151_v35 = vld [vmem:[#allocation4 + $0x78] sm:$0xf0]  ;;  %v1214_v37 = vor.u32 %v1510_v28, %v1213_v27  ;;  %v1141_v40 = vld [vmem:[#allocation4 + $0x60] sm:$0xf]  ;;  %vm162_vm2 = vcmask 187392  }
  0x1e   :  { %188 = vmatpush.bf16.msra.mxu0 %v171_v19  ;;  %201 = vmatpush.bf16.msra.mxu1 %v174_v20  ;;  %v1509_v38 = vld [vmem:[#allocation4 + $0xf4] sm:$0xf]  ;;  %v1215_v39 = vld [vmem:[#allocation4 + $0xf8] sm:$0xf0]  ;;  %v115_v41 = vpack.c.bf16 %v114_v31, %v114_v31  ;;  %v1492_v42 = vld [vmem:[#allocation4 + $0x64] sm:$0xf0]  ;;  %v1154_v45 = vor.u32 %v1493_v34, %v1151_v35 }
  0x1f   :  { %214 = vmatpush.bf16.msra.mxu2 %v177_v21  ;;  %227 = vmatpush.bf16.msra.mxu3 %v180_v22  ;;  %v1205_v43 = vld [vmem:[#allocation4 + $0xe0] sm:$0xf]  ;;  %v1508_v44 = vld [vmem:[#allocation4 + $0xe4] sm:$0xf0]  ;;  %v1218_v46 = vor.u32 %v1509_v38, %v1215_v39  ;;  %v1491_v47 = vld [vmem:[#allocation4 + $0x64] sm:$0xf]  ;;  %v1142_v49 = vor.u32 %v1492_v42, %v1141_v40 }
  0x20   :  { %v1143_v48 = vld [vmem:[#allocation4 + $0x68] sm:$0xf0]  ;;  %v1206_v50 = vor.u32 %v1508_v44, %v1205_v43  ;;  %v1507_v51 = vld [vmem:[#allocation4 + $0xe4] sm:$0xf]  ;;  %v1133_v53 = vld [vmem:[#allocation4 + $0x50] sm:$0xf] }
  0x21   :  { %v1207_v52 = vld [vmem:[#allocation4 + $0xe8] sm:$0xf0]  ;;  %v1490_v54 = vld [vmem:[#allocation4 + $0x54] sm:$0xf0]  ;;  %v1197_v55 = vld [vmem:[#allocation4 + $0xd0] sm:$0xf]  ;;  %v1146_v57 = vor.u32 %v1491_v47, %v1143_v48 }
  0x22   :  { %189 = vmatpush.bf16.msra.mxu0 %v1074_v29  ;;  %202 = vmatpush.bf16.msra.mxu1 %v1078_v30  ;;  %v1506_v56 = vld [vmem:[#allocation4 + $0xd4] sm:$0xf0]  ;;  %v1210_v58 = vor.u32 %v1507_v51, %v1207_v52  ;;  %v1489_v59 = vld [vmem:[#allocation4 + $0x54] sm:$0xf]  ;;  %v1135_v60 = vld [vmem:[#allocation4 + $0x58] sm:$0xf0]  ;;  %v1134_v61 = vor.u32 %v1490_v54, %v1133_v53 }
  0x23   :  { %215 = vmatpush.bf16.msra.mxu2 %v1082_v32  ;;  %228 = vmatpush.bf16.msra.mxu3 %v1086_v33  ;;  %v1198_v62 = vor.u32 %v1506_v56, %v1197_v55  ;;  %v1505_v63 = vld [vmem:[#allocation4 + $0xd4] sm:$0xf]  ;;  %v1199_v0 = vld [vmem:[#allocation4 + $0xd8] sm:$0xf0]  ;;  %v1125_v1 = vld [vmem:[#allocation4 + $0x40] sm:$0xf]  ;;  %v1138_v5 = vor.u32 %v1489_v59, %v1135_v60 }
  0x24   :  { %v1488_v2 = vld [vmem:[#allocation4 + $0x44] sm:$0xf0]  ;;  %v1189_v3 = vld [vmem:[#allocation4 + $0xc0] sm:$0xf]  ;;  %v1202_v6 = vor.u32 %v1505_v63, %v1199_v0  ;;  %v1487_v7 = vld [vmem:[#allocation4 + $0x44] sm:$0xf] }
  0x25   :  { %1087 = vmatmul.msk.bf16.vlgmr.msra.gmra.mxu0 %vm162_vm2, %v115_v41  ;;  %1088 = vmatmul.msk.bf16.vlgmr.msra.gmra.mxu1 %vm162_vm2, %v115_v41  ;;  %v1504_v4 = vld [vmem:[#allocation4 + $0xc4] sm:$0xf0]  ;;  %v1127_v8 = vld [vmem:[#allocation4 + $0x48] sm:$0xf0]  ;;  %v1126_v9 = vor.u32 %v1488_v2, %v1125_v1  ;;  %v1503_v11 = vld [vmem:[#allocation4 + $0xc4] sm:$0xf] }
  0x26   :  { %440 = vmatpush.bf16.msrb.mxu0 %v1150_v36  ;;  %453 = vmatpush.bf16.msrb.mxu1 %v1214_v37  ;;  %v1190_v10 = vor.u32 %v1504_v4, %v1189_v3  ;;  %v1191_v12 = vld [vmem:[#allocation4 + $0xc8] sm:$0xf0]  ;;  %v1117_v13 = vld [vmem:[#allocation4 + $0x30] sm:$0xf]  ;;  %v1486_v14 = vld [vmem:[#allocation4 + $0x34] sm:$0xf0]  ;;  %v1130_v17 = vor.u32 %v1487_v7, %v1127_v8 }
  0x27   :  { %1089 = vmatmul.msk.bf16.vlgmr.msra.gmra.mxu2 %vm162_vm2, %v115_v41  ;;  %1090 = vmatmul.msk.bf16.vlgmr.msra.gmra.mxu3 %vm162_vm2, %v115_v41  ;;  %v1181_v15 = vld [vmem:[#allocation4 + $0xb0] sm:$0xf]  ;;  %v1502_v16 = vld [vmem:[#allocation4 + $0xb4] sm:$0xf0]  ;;  %v1194_v18 = vor.u32 %v1503_v11, %v1191_v12  ;;  %v1485_v19 = vld [vmem:[#allocation4 + $0x34] sm:$0xf]  ;;  %v1118_v21 = vor.u32 %v1486_v14, %v1117_v13 }
  0x28   :  { %466 = vmatpush.bf16.msrb.mxu2 %v1154_v45  ;;  %479 = vmatpush.bf16.msrb.mxu3 %v1218_v46  ;;  %v1119_v20 = vld [vmem:[#allocation4 + $0x38] sm:$0xf0]  ;;  %v1182_v22 = vor.u32 %v1502_v16, %v1181_v15  ;;  %v1501_v23 = vld [vmem:[#allocation4 + $0xb4] sm:$0xf]  ;;  %v1109_v25 = vld [vmem:[#allocation4 + $0x20] sm:$0xf] }
  0x29   :  { %v1183_v24 = vld [vmem:[#allocation4 + $0xb8] sm:$0xf0]  ;;  %v1484_v26 = vld [vmem:[#allocation4 + $0x24] sm:$0xf0]  ;;  %v1173_v27 = vld [vmem:[#allocation4 + $0xa0] sm:$0xf]  ;;  %v1122_v29 = vor.u32 %v1485_v19, %v1119_v20 }
  0x2a   :  { %441 = vmatpush.bf16.msrb.mxu0 %v1142_v49  ;;  %454 = vmatpush.bf16.msrb.mxu1 %v1206_v50  ;;  %v1500_v28 = vld [vmem:[#allocation4 + $0xa4] sm:$0xf0]  ;;  %v1186_v30 = vor.u32 %v1501_v23, %v1183_v24  ;;  %v1483_v31 = vld [vmem:[#allocation4 + $0x24] sm:$0xf]  ;;  %v1111_v32 = vld [vmem:[#allocation4 + $0x28] sm:$0xf0]  ;;  %v1110_v34 = vor.u32 %v1484_v26, %v1109_v25 }
  0x2b   :  { %v1499_v33 = vld [vmem:[#allocation4 + $0xa4] sm:$0xf]  ;;  %v1174_v35 = vor.u32 %v1500_v28, %v1173_v27  ;;  %v1175_v36 = vld [vmem:[#allocation4 + $0xa8] sm:$0xf0]  ;;  %v1101_v37 = vld [vmem:[#allocation4 + $0x10] sm:$0xf]  ;;  %v1114_v41 = vor.u32 %v1483_v31, %v1111_v32 }
  0x2c   :  { %467 = vmatpush.bf16.msrb.mxu2 %v1146_v57  ;;  %480 = vmatpush.bf16.msrb.mxu3 %v1210_v58  ;;  %v1482_v38 = vld [vmem:[#allocation4 + $0x14] sm:$0xf0]  ;;  %v1165_v39 = vld [vmem:[#allocation4 + $0x90] sm:$0xf]  ;;  %v1178_v42 = vor.u32 %v1499_v33, %v1175_v36  ;;  %v1481_v43 = vld [vmem:[#allocation4 + $0x14] sm:$0xf] }
  0x2d   :  { %v1498_v40 = vld [vmem:[#allocation4 + $0x94] sm:$0xf0]  ;;  %v1103_v44 = vld [vmem:[#allocation4 + $0x18] sm:$0xf0]  ;;  %v1497_v45 = vld [vmem:[#allocation4 + $0x94] sm:$0xf]  ;;  %v1102_v46 = vor.u32 %v1482_v38, %v1101_v37 }
  0x2e   :  { %442 = vmatpush.bf16.msrb.mxu0 %v1134_v61  ;;  %455 = vmatpush.bf16.msrb.mxu1 %v1198_v62  ;;  %v1166_v47 = vor.u32 %v1498_v40, %v1165_v39  ;;  %v1167_v48 = vld [vmem:[#allocation4 + $0x98] sm:$0xf0]  ;;  %v1093_v49 = vld [vmem:[#allocation4] sm:$0xf]  ;;  %v1480_v50 = vld [vmem:[#allocation4 + $0x4] sm:$0xf0]  ;;  %v1106_v57 = vor.u32 %v1481_v43, %v1103_v44 }
  0x2f   :  { %v1157_v51 = vld [vmem:[#allocation4 + $0x80] sm:$0xf]  ;;  %v1496_v52 = vld [vmem:[#allocation4 + $0x84] sm:$0xf0]  ;;  %v1277_v53 = vld [vmem:[#allocation6 + $0x70] sm:$0xf]  ;;  %v1170_v58 = vor.u32 %v1497_v45, %v1167_v48  ;;  %v1094_v62 = vor.u32 %v1480_v50, %v1093_v49 }
  0x30   :  { %468 = vmatpush.bf16.msrb.mxu2 %v1138_v5  ;;  %481 = vmatpush.bf16.msrb.mxu3 %v1202_v6  ;;  %v1526_v54 = vld [vmem:[#allocation6 + $0x74] sm:$0xf0]  ;;  %v1341_v55 = vld [vmem:[#allocation6 + $0xf0] sm:$0xf]  ;;  %v1479_v59 = vld [vmem:[#allocation4 + $0x4] sm:$0xf]  ;;  %v1158_v63 = vor.u32 %v1496_v52, %v1157_v51 }
  0x31   :  { %v1542_v56 = vld [vmem:[#allocation6 + $0xf4] sm:$0xf0]  ;;  %v1095_v60 = vld [vmem:[#allocation4 + $0x8] sm:$0xf0]  ;;  %v1495_v61 = vld [vmem:[#allocation4 + $0x84] sm:$0xf]  ;;  %v1278_v3 = vor.u32 %v1526_v54, %v1277_v53 }
  0x32   :  { %443 = vmatpush.bf16.msrb.mxu0 %v1126_v9  ;;  %456 = vmatpush.bf16.msrb.mxu1 %v1190_v10  ;;  %v1159_v0 = vld [vmem:[#allocation4 + $0x88] sm:$0xf0]  ;;  %v1525_v1 = vld [vmem:[#allocation6 + $0x74] sm:$0xf]  ;;  %v1279_v2 = vld [vmem:[#allocation6 + $0x78] sm:$0xf0]  ;;  %v1342_v4 = vor.u32 %v1542_v56, %v1341_v55  ;;  %v1098_v11 = vor.u32 %v1479_v59, %v1095_v60 }
  0x33   :  { %v1541_v5 = vld [vmem:[#allocation6 + $0xf4] sm:$0xf]  ;;  %v1343_v6 = vld [vmem:[#allocation6 + $0xf8] sm:$0xf0]  ;;  %v1269_v7 = vld [vmem:[#allocation6 + $0x60] sm:$0xf]  ;;  %v1162_v12 = vor.u32 %v1495_v61, %v1159_v0  ;;  %v1282_v13 = vor.u32 %v1525_v1, %v1279_v2 }
  0x34   :  { %469 = vmatpush.bf16.msrb.mxu2 %v1130_v17  ;;  %482 = vmatpush.bf16.msrb.mxu3 %v1194_v18  ;;  %v1524_v8 = vld [vmem:[#allocation6 + $0x64] sm:$0xf0]  ;;  %v1333_v9 = vld [vmem:[#allocation6 + $0xe0] sm:$0xf]  ;;  %v1346_v14 = vor.u32 %v1541_v5, %v1343_v6  ;;  %v1523_v15 = vld [vmem:[#allocation6 + $0x64] sm:$0xf] }
  0x35   :  { %v1540_v10 = vld [vmem:[#allocation6 + $0xe4] sm:$0xf0]  ;;  %v1270_v16 = vor.u32 %v1524_v8, %v1269_v7  ;;  %v1271_v18 = vld [vmem:[#allocation6 + $0x68] sm:$0xf0]  ;;  %v1539_v19 = vld [vmem:[#allocation6 + $0xe4] sm:$0xf] }
  0x36   :  { %444 = vmatpush.bf16.msrb.mxu0 %v1118_v21  ;;  %457 = vmatpush.bf16.msrb.mxu1 %v1182_v22  ;;  %v1334_v17 = vor.u32 %v1540_v10, %v1333_v9  ;;  %v1335_v20 = vld [vmem:[#allocation6 + $0xe8] sm:$0xf0]  ;;  %v1274_v21 = vor.u32 %v1523_v15, %v1271_v18  ;;  %v1261_v23 = vld [vmem:[#allocation6 + $0x50] sm:$0xf]  ;;  %v1522_v24 = vld [vmem:[#allocation6 + $0x54] sm:$0xf0] }
  0x37   :  { %v1338_v22 = vor.u32 %v1539_v19, %v1335_v20  ;;  %v1325_v25 = vld [vmem:[#allocation6 + $0xd0] sm:$0xf]  ;;  %v1262_v26 = vor.u32 %v1522_v24, %v1261_v23  ;;  %v1538_v27 = vld [vmem:[#allocation6 + $0xd4] sm:$0xf0]  ;;  %v1521_v28 = vld [vmem:[#allocation6 + $0x54] sm:$0xf] }
  0x38   :  { %470 = vmatpush.bf16.msrb.mxu2 %v1122_v29  ;;  %483 = vmatpush.bf16.msrb.mxu3 %v1186_v30  ;;  %v1263_v29 = vld [vmem:[#allocation6 + $0x58] sm:$0xf0]  ;;  %v1326_v30 = vor.u32 %v1538_v27, %v1325_v25  ;;  %v1537_v32 = vld [vmem:[#allocation6 + $0xd4] sm:$0xf]  ;;  %v1520_v36 = vld [vmem:[#allocation6 + $0x44] sm:$0xf0] }
  0x39   :  { %v1266_v31 = vor.u32 %v1521_v28, %v1263_v29  ;;  %v1327_v33 = vld [vmem:[#allocation6 + $0xd8] sm:$0xf0]  ;;  %v1317_v37 = vld [vmem:[#allocation6 + $0xc0] sm:$0xf]  ;;  %v1536_v39 = vld [vmem:[#allocation6 + $0xc4] sm:$0xf0] }
  0x3a   :  { %445 = vmatpush.bf16.msrb.mxu0 %v1110_v34  ;;  %458 = vmatpush.bf16.msrb.mxu1 %v1174_v35  ;;  %v1330_v34 = vor.u32 %v1537_v32, %v1327_v33  ;;  %v1253_v35 = vld [vmem:[#allocation6 + $0x40] sm:$0xf]  ;;  %v1519_v40 = vld [vmem:[#allocation6 + $0x44] sm:$0xf]  ;;  %v1319_v45 = vld [vmem:[#allocation6 + $0xc8] sm:$0xf0] }
  0x3b   :  { %v1254_v38 = vor.u32 %v1520_v36, %v1253_v35  ;;  %v1535_v44 = vld [vmem:[#allocation6 + $0xc4] sm:$0xf]  ;;  %v1518_v48 = vld [vmem:[#allocation6 + $0x34] sm:$0xf0]  ;;  %v1309_v49 = vld [vmem:[#allocation6 + $0xb0] sm:$0xf] }
  0x3c   :  { %471 = vmatpush.bf16.msrb.mxu2 %v1114_v41  ;;  %484 = vmatpush.bf16.msrb.mxu3 %v1178_v42  ;;  %v1255_v41 = vld [vmem:[#allocation6 + $0x48] sm:$0xf0]  ;;  %v1318_v42 = vor.u32 %v1536_v39, %v1317_v37  ;;  %v1534_v51 = vld [vmem:[#allocation6 + $0xb4] sm:$0xf0]  ;;  %v1517_v52 = vld [vmem:[#allocation6 + $0x34] sm:$0xf] }
  0x3d   :  { %v1258_v43 = vor.u32 %v1519_v40, %v1255_v41  ;;  %v1247_v53 = vld [vmem:[#allocation6 + $0x38] sm:$0xf0]  ;;  %v1310_v54 = vor.u32 %v1534_v51, %v1309_v49  ;;  %v1533_v56 = vld [vmem:[#allocation6 + $0xb4] sm:$0xf]  ;;  %v1237_v59 = vld [vmem:[#allocation6 + $0x20] sm:$0xf] }
  0x3e   :  { %446 = vmatpush.bf16.msrb.mxu0 %v1102_v46  ;;  %459 = vmatpush.bf16.msrb.mxu1 %v1166_v47  ;;  %v1322_v46 = vor.u32 %v1535_v44, %v1319_v45  ;;  %v1245_v47 = vld [vmem:[#allocation6 + $0x30] sm:$0xf]  ;;  %v1250_v55 = vor.u32 %v1517_v52, %v1247_v53  ;;  %v1516_v60 = vld [vmem:[#allocation6 + $0x24] sm:$0xf0]  ;;  %v1301_v61 = vld [vmem:[#allocation6 + $0xa0] sm:$0xf] }
  0x3f   :  { %v1246_v50 = vor.u32 %v1518_v48, %v1245_v47  ;;  %v1515_v0 = vld [vmem:[#allocation6 + $0x24] sm:$0xf]  ;;  %v1239_v1 = vld [vmem:[#allocation6 + $0x28] sm:$0xf0]  ;;  %v1229_v7 = vld [vmem:[#allocation6 + $0x10] sm:$0xf] }
  0x40   :  { %472 = vmatpush.bf16.msrb.mxu2 %v1106_v57  ;;  %485 = vmatpush.bf16.msrb.mxu3 %v1170_v58  ;;  %v1311_v57 = vld [vmem:[#allocation6 + $0xb8] sm:$0xf0]  ;;  %v1303_v5 = vld [vmem:[#allocation6 + $0xa8] sm:$0xf0]  ;;  %v1514_v8 = vld [vmem:[#allocation6 + $0x14] sm:$0xf0] }
  0x41   :  { %v1314_v58 = vor.u32 %v1533_v56, %v1311_v57  ;;  %v1293_v9 = vld [vmem:[#allocation6 + $0x90] sm:$0xf]  ;;  %v1230_v10 = vor.u32 %v1514_v8, %v1229_v7  ;;  %v1221_v18 = vld [vmem:[#allocation6] sm:$0xf]  ;;  %v1512_v20 = vld [vmem:[#allocation6 + $0x4] sm:$0xf0] }
  0x42   :  { %447 = vmatpush.bf16.msrb.mxu0 %v1094_v62  ;;  %460 = vmatpush.bf16.msrb.mxu1 %v1158_v63  ;;  %v1238_v62 = vor.u32 %v1516_v60, %v1237_v59  ;;  %v1532_v63 = vld [vmem:[#allocation6 + $0xa4] sm:$0xf0]  ;;  %v1222_v23 = vor.u32 %v1512_v20, %v1221_v18  ;;  %v1511_v25 = vld [vmem:[#allocation6 + $0x4] sm:$0xf]  ;;  %v1287_v29 = vld [vmem:[#allocation6 + $0x88] sm:$0xf0] }
  0x43   :  { %v1302_v2 = vor.u32 %v1532_v63, %v1301_v61  ;;  %v1527_v27 = vld [vmem:[#allocation6 + $0x84] sm:$0xf]  ;;  %v1566_v44 = vld [vmem:[#allocation9 + $0x38] sm:$0xff]  ;;  %v1549_v51 = vld [vmem:[#allocation7 + $0x30] sm:$0xff] }
  0x44   :  { %473 = vmatpush.bf16.msrb.mxu2 %v1098_v11  ;;  %486 = vmatpush.bf16.msrb.mxu3 %v1162_v12  ;;  %v1530_v11 = vld [vmem:[#allocation6 + $0x94] sm:$0xf0]  ;;  %v1513_v12 = vld [vmem:[#allocation6 + $0x14] sm:$0xf]  ;;  %v1548_v56 = vld [vmem:[#allocation7 + $0x28] sm:$0xff] }
  0x45   :  { %v1557_v52 = vld [vmem:[#allocation7 + $0x70] sm:$0xff]  ;;  %v1556_v57 = vld [vmem:[#allocation7 + $0x68] sm:$0xff]  ;;  %v1555_v63 = vld [vmem:[#allocation7 + $0x60] sm:$0xff] }
  0x46   :  { %692 = vmatpush.bf16.msra.mxu0 %v1278_v3  ;;  %705 = vmatpush.bf16.msra.mxu1 %v1342_v4  ;;  %v1242_v3 = vor.u32 %v1515_v0, %v1239_v1  ;;  %v1531_v4 = vld [vmem:[#allocation6 + $0xa4] sm:$0xf]  ;;  %v1565_v53 = vld [vmem:[#allocation9 + $0x30] sm:$0xff]  ;;  %v1544_v7 = vld [vmem:[#allocation7 + $0x8] sm:$0xff] }
  0x47   :  { %v1306_v6 = vor.u32 %v1531_v4, %v1303_v5  ;;  %v1574_v4 = vld [vmem:[#allocation9 + $0x78] sm:$0xff]  ;;  %v1573_v8 = vld [vmem:[#allocation9 + $0x70] sm:$0xff] }
  0x48   :  { %718 = vmatpush.bf16.msra.mxu2 %v1282_v13  ;;  %731 = vmatpush.bf16.msra.mxu3 %v1346_v14  ;;  %v1231_v13 = vld [vmem:[#allocation6 + $0x18] sm:$0xf0]  ;;  %v1294_v14 = vor.u32 %v1530_v11, %v1293_v9  ;;  %v1553_v9 = vld [vmem:[#allocation7 + $0x50] sm:$0xff]  ;;  %v1543_v11 = vld [vmem:[#allocation7] sm:$0xff] }
  0x49   :  { %v1234_v15 = vor.u32 %v1513_v12, %v1231_v13  ;;  %v1554_v5 = vld [vmem:[#allocation7 + $0x58] sm:$0xff]  ;;  %v1572_v12 = vld [vmem:[#allocation9 + $0x68] sm:$0xff]  ;;  %v1569_v20 = vld [vmem:[#allocation9 + $0x50] sm:$0xff] }
  0x4a   :  { %693 = vmatpush.bf16.msra.mxu0 %v1270_v16  ;;  %706 = vmatpush.bf16.msra.mxu1 %v1334_v17  ;;  %v1529_v16 = vld [vmem:[#allocation6 + $0x94] sm:$0xf]  ;;  %v1295_v17 = vld [vmem:[#allocation6 + $0x98] sm:$0xf0]  ;;  %v1552_v13 = vld [vmem:[#allocation7 + $0x48] sm:$0xff] }
  0x4b   :  { %v1298_v19 = vor.u32 %v1529_v16, %v1295_v17  ;;  %v1551_v16 = vld [vmem:[#allocation7 + $0x40] sm:$0xff]  ;;  %v1561_v17 = vld [vmem:[#allocation9 + $0x10] sm:$0xff]  ;;  %v1570_v18 = vld [vmem:[#allocation9 + $0x58] sm:$0xff] }
  0x4c   :  { %719 = vmatpush.bf16.msra.mxu2 %v1274_v21  ;;  %732 = vmatpush.bf16.msra.mxu3 %v1338_v22  ;;  %v1285_v21 = vld [vmem:[#allocation6 + $0x80] sm:$0xf]  ;;  %v1528_v22 = vld [vmem:[#allocation6 + $0x84] sm:$0xf0] }
  0x4d   :  { %v1286_v24 = vor.u32 %v1528_v22, %v1285_v21  ;;  %v1559_v21 = vld [vmem:[#allocation9] sm:$0xff]  ;;  %v1568_v22 = vld [vmem:[#allocation9 + $0x48] sm:$0xff] }
  0x4e   :  { %694 = vmatpush.bf16.msra.mxu0 %v1262_v26  ;;  %707 = vmatpush.bf16.msra.mxu1 %v1326_v30  ;;  %v1223_v26 = vld [vmem:[#allocation6 + $0x8] sm:$0xf0]  ;;  %v1290_v30 = vor.u32 %v1527_v27, %v1287_v29 }
  0x4f   :  { %v1226_v28 = vor.u32 %v1511_v25, %v1223_v26 }
  0x50   :  { %720 = vmatpush.bf16.msra.mxu2 %v1266_v31  ;;  %733 = vmatpush.bf16.msra.mxu3 %v1330_v34  ;;  %v122_v31 = vld [vmem:[%s1820_s2] sm:$0xf] }
  0x51   :  { %v124_v32 = vperm.slane %v122_v31, 0  ;;  %v125_v33 = vperm.slane %v122_v31, 1  ;;  %v126_v45 = vperm.slane %v122_v31, 2  ;;  %v127_v47 = vperm.slane %v122_v31, 3 }
  0x52   :  { %695 = vmatpush.bf16.msra.mxu0 %v1254_v38  ;;  %708 = vmatpush.bf16.msra.mxu1 %v1318_v42  ;;  %v1550_v42 = vld [vmem:[#allocation7 + $0x38] sm:$0xff] }
  0x54   :  { %721 = vmatpush.bf16.msra.mxu2 %v1258_v43  ;;  %734 = vmatpush.bf16.msra.mxu3 %v1322_v46  ;;  %v1558_v43 = vld [vmem:[#allocation7 + $0x78] sm:$0xff] }
  0x56   :  { %696 = vmatpush.bf16.msra.mxu0 %v1246_v50  ;;  %709 = vmatpush.bf16.msra.mxu1 %v1310_v54 }
  0x58   :  { %722 = vmatpush.bf16.msra.mxu2 %v1250_v55  ;;  %735 = vmatpush.bf16.msra.mxu3 %v1314_v58 }
  0x5a   :  { %697 = vmatpush.bf16.msra.mxu0 %v1238_v62  ;;  %710 = vmatpush.bf16.msra.mxu1 %v1302_v2  ;;  %v1547_v62 = vld [vmem:[#allocation7 + $0x20] sm:$0xff]  ;;  %v1546_v2 = vld [vmem:[#allocation7 + $0x18] sm:$0xff] }
  0x5c   :  { %723 = vmatpush.bf16.msra.mxu2 %v1242_v3  ;;  %736 = vmatpush.bf16.msra.mxu3 %v1306_v6  ;;  %v1545_v3 = vld [vmem:[#allocation7 + $0x10] sm:$0xff]  ;;  %v1564_v6 = vld [vmem:[#allocation9 + $0x28] sm:$0xff] }
  0x5e   :  { %698 = vmatpush.bf16.msra.mxu0 %v1230_v10  ;;  %711 = vmatpush.bf16.msra.mxu1 %v1294_v14  ;;  %v1563_v10 = vld [vmem:[#allocation9 + $0x20] sm:$0xff]  ;;  %v1562_v14 = vld [vmem:[#allocation9 + $0x18] sm:$0xff] }
  0x60   :  { %724 = vmatpush.bf16.msra.mxu2 %v1234_v15  ;;  %737 = vmatpush.bf16.msra.mxu3 %v1298_v19  ;;  %v1571_v15 = vld [vmem:[#allocation9 + $0x60] sm:$0xff]  ;;  %v1560_v19 = vld [vmem:[#allocation9 + $0x8] sm:$0xff] }
  0x62   :  { %699 = vmatpush.bf16.msra.mxu0 %v1222_v23  ;;  %712 = vmatpush.bf16.msra.mxu1 %v1286_v24  ;;  %v274_v23 = vld [vmem:[%s1822_s4] sm:$0x3]  ;;  %v1567_v24 = vld [vmem:[#allocation9 + $0x40] sm:$0xff] }
  0x63   :  { %v276_v25 = vperm.slane %v274_v23, 0 }
  0x64   :  { %725 = vmatpush.bf16.msra.mxu2 %v1226_v28  ;;  %738 = vmatpush.bf16.msra.mxu3 %v1290_v30  ;;  %v277_v30 = vperm.slane %v274_v23, 1 }
  0xa2   :  { %v191_v34 = vpop.f32.mrf.mxu0  ;;  %v204_v35 = vpop.f32.mrf.mxu1 }
  0xa3   :  { %v192_v36 = vadd.f32 %v191_v34, %v124_v32  ;;  %v205_v37 = vadd.f32 %v204_v35, %v125_v33 }
  0xa5   :  { %v234_v38 = vmax.f32 %v192_v36, 0.0  ;;  %v235_v39 = vmax.f32 %v205_v37, 0.0 }
  0xa7   :  { %v238_v40 = vpack.c.bf16 %v234_v38, %v234_v38  ;;  %v239_v41 = vpack.c.bf16 %v235_v39, %v235_v39  ;;  %v526_v39 = vld [vmem:[%s1824_s6] sm:$0x3] }
  0xa9   :  { %448 = vmatmul.bf16.vlgmr.msrb.gmra.mxu0 %v238_v40  ;;  %461 = vmatmul.bf16.vlgmr.msrb.gmra.mxu1 %v239_v41 }
  0xaa   :  { %v217_v46 = vpop.f32.mrf.mxu2  ;;  %v230_v48 = vpop.f32.mrf.mxu3  ;;  %474 = vmatmul.bf16.vlgmr.msrb.gmra.mxu2 %v238_v40  ;;  %487 = vmatmul.bf16.vlgmr.msrb.gmra.mxu3 %v239_v41  ;;  %v528_v41 = vperm.slane %v526_v39, 0 }
  0xab   :  { %v193_v49 = vpop.f32.mrf.mxu0  ;;  %v206_v50 = vpop.f32.mrf.mxu1  ;;  %1032 = vmatpush.bf16.msrb.mxu2 %v1550_v42  ;;  %1045 = vmatpush.bf16.msrb.mxu3 %v1558_v43  ;;  %v218_v54 = vadd.f32 %v217_v46, %v126_v45  ;;  %v231_v55 = vadd.f32 %v230_v48, %v127_v47 }
  0xac   :  { %910 = vmatpush.bf16.msrb.mxu0 %v1566_v44  ;;  %923 = vmatpush.bf16.msrb.mxu1 %v1574_v4  ;;  %v529_v49 = vperm.slane %v526_v39, 1 }
  0xad   :  { %v236_v58 = vmax.f32 %v218_v54, 0.0  ;;  %v237_v59 = vmax.f32 %v231_v55, 0.0 }
  0xaf   :  { %1033 = vmatpush.bf16.msrb.mxu2 %v1549_v51  ;;  %1046 = vmatpush.bf16.msrb.mxu3 %v1557_v52  ;;  %v240_v0 = vpack.c.bf16 %v236_v58, %v236_v58  ;;  %v241_v1 = vpack.c.bf16 %v237_v59, %v237_v59 }
  0xb0   :  { %911 = vmatpush.bf16.msrb.mxu0 %v1565_v53  ;;  %924 = vmatpush.bf16.msrb.mxu1 %v1573_v8 }
  0xb2   :  { %v219_v60 = vpop.f32.mrf.mxu2  ;;  %v232_v61 = vpop.f32.mrf.mxu3 }
  0xb3   :  { %1034 = vmatpush.bf16.msrb.mxu2 %v1548_v56  ;;  %1047 = vmatpush.bf16.msrb.mxu3 %v1556_v57 }
  0xb4   :  { %912 = vmatpush.bf16.msrb.mxu0 %v1564_v6  ;;  %925 = vmatpush.bf16.msrb.mxu1 %v1572_v12 }
  0xb7   :  { %1035 = vmatpush.bf16.msrb.mxu2 %v1547_v62  ;;  %1048 = vmatpush.bf16.msrb.mxu3 %v1555_v63 }
  0xb8   :  { %913 = vmatpush.bf16.msrb.mxu0 %v1563_v10  ;;  %926 = vmatpush.bf16.msrb.mxu1 %v1571_v15 }
  0xb9   :  { %700 = vmatmul.bf16.vlgmr.msra.gmra.mxu0 %v240_v0  ;;  %713 = vmatmul.bf16.vlgmr.msra.gmra.mxu1 %v241_v1 }
  0xba   :  { %726 = vmatmul.bf16.vlgmr.msra.gmra.mxu2 %v240_v0  ;;  %739 = vmatmul.bf16.vlgmr.msra.gmra.mxu3 %v241_v1 }
  0xbb   :  { %1036 = vmatpush.bf16.msrb.mxu2 %v1546_v2  ;;  %1049 = vmatpush.bf16.msrb.mxu3 %v1554_v5 }
  0xbc   :  { %914 = vmatpush.bf16.msrb.mxu0 %v1562_v14  ;;  %927 = vmatpush.bf16.msrb.mxu1 %v1570_v18 }
  0xbf   :  { %1037 = vmatpush.bf16.msrb.mxu2 %v1545_v3  ;;  %1050 = vmatpush.bf16.msrb.mxu3 %v1553_v9 }
  0xc0   :  { %915 = vmatpush.bf16.msrb.mxu0 %v1561_v17  ;;  %928 = vmatpush.bf16.msrb.mxu1 %v1569_v20 }
  0xc3   :  { %1038 = vmatpush.bf16.msrb.mxu2 %v1544_v7  ;;  %1051 = vmatpush.bf16.msrb.mxu3 %v1552_v13  ;;  %v1587_v7 = vld [vmem:[%s1827_s9] ss:$0 sm:$0xff] }
  0xc4   :  { %916 = vmatpush.bf16.msrb.mxu0 %v1560_v19  ;;  %929 = vmatpush.bf16.msrb.mxu1 %v1568_v22 }
  0xc7   :  { %1039 = vmatpush.bf16.msrb.mxu2 %v1543_v11  ;;  %1052 = vmatpush.bf16.msrb.mxu3 %v1551_v16 }
  0xc8   :  { %917 = vmatpush.bf16.msrb.mxu0 %v1559_v21  ;;  %930 = vmatpush.bf16.msrb.mxu1 %v1567_v24 }
 0x126   :  { %v449_v26 = vpop.f32.mrf.mxu0  ;;  %v462_v27 = vpop.f32.mrf.mxu1 }
 0x127   :  { %v450_v28 = vadd.f32 %v449_v26, %v276_v25 }
 0x129   :  { %v463_v29 = vadd.f32 %v462_v27, %v450_v28 }
 0x12b   :  { %v492_v31 = vmax.f32 %v463_v29, 0.0 }
 0x12d   :  { %v746_v32 = vpack.c.bf16 %v492_v31, %v492_v31  ;;  %v475_v33 = vpop.f32.mrf.mxu2  ;;  %v488_v34 = vpop.f32.mrf.mxu3 }
 0x12e   :  { %v476_v35 = vadd.f32 %v475_v33, %v277_v30  ;;  %v451_v36 = vpop.f32.mrf.mxu0  ;;  %v464_v37 = vpop.f32.mrf.mxu1 }
 0x12f   :  { %1040 = vmatmul.bf16.vlgmr.msrb.gmra.mxu2 %v746_v32 }
 0x130   :  { %v489_v38 = vadd.f32 %v488_v34, %v476_v35 }
 0x132   :  { %v493_v40 = vmax.f32 %v489_v38, 0.0 }
 0x134   :  { %v747_v42 = vpack.c.bf16 %v493_v40, %v493_v40 }
 0x135   :  { %v477_v43 = vpop.f32.mrf.mxu2  ;;  %v490_v44 = vpop.f32.mrf.mxu3 }
 0x136   :  { %1053 = vmatmul.bf16.vlgmr.msrb.gmra.mxu3 %v747_v42  ;;  %v701_v45 = vpop.f32.mrf.mxu0  ;;  %v714_v46 = vpop.f32.mrf.mxu1 }
 0x137   :  { %v702_v47 = vadd.f32 %v701_v45, %v528_v41 }
 0x139   :  { %v715_v48 = vadd.f32 %v714_v46, %v702_v47 }
 0x13b   :  { %v744_v50 = vmax.f32 %v715_v48, 0.0 }
 0x13d   :  { %v780_v51 = vpack.c.bf16 %v744_v50, %v744_v50  ;;  %v727_v52 = vpop.f32.mrf.mxu2  ;;  %v740_v53 = vpop.f32.mrf.mxu3 }
 0x13e   :  { %v728_v54 = vadd.f32 %v727_v52, %v529_v49  ;;  %v703_v55 = vpop.f32.mrf.mxu0  ;;  %v716_v56 = vpop.f32.mrf.mxu1 }
 0x13f   :  { %918 = vmatmul.bf16.vlgmr.msrb.gmra.mxu0 %v780_v51 }
 0x140   :  { %v741_v57 = vadd.f32 %v740_v53, %v728_v54 }
 0x142   :  { %v745_v58 = vmax.f32 %v741_v57, 0.0 }
 0x144   :  { %v781_v59 = vpack.c.bf16 %v745_v58, %v745_v58 }
 0x145   :  { %v729_v60 = vpop.f32.mrf.mxu2  ;;  %v742_v61 = vpop.f32.mrf.mxu3 }
 0x146   :  { %931 = vmatmul.bf16.vlgmr.msrb.gmra.mxu1 %v781_v59 }
 0x1b2   :  { %v1041_v62 = vpop.f32.mrf.mxu2 }
 0x1b9   :  { %v1054_v63 = vpop.f32.mrf.mxu3 }
 0x1ba   :  { %v1043_v0 = vpop.f32.mrf.mxu2 }
 0x1bc   :  { %v919_v1 = vpop.f32.mrf.mxu0 }
 0x1c1   :  { %v1056_v2 = vpop.f32.mrf.mxu3 }
 0x1c3   :  { %v932_v3 = vpop.f32.mrf.mxu1 }
 0x1c4   :  { %v933_v4 = vadd.f32 %v932_v3, %v919_v1  ;;  %v921_v5 = vpop.f32.mrf.mxu0 }
 0x1c6   :  { %v1042_v6 = vadd.f32 %v1041_v62, %v933_v4 }
 0x1c8   :  { %v1055_v8 = vadd.f32 %v1054_v63, %v1042_v6 }
 0x1ca   :  { %v1062_v9 = vadd.f32 %v1587_v7, %v1055_v8 }
 0x1cb   :  { %v934_v10 = vpop.f32.mrf.mxu1 }
 0x1cc   :  { %1063 = vst [vmem:[%s1828_s10] sm:$0xff] %v1062_v9 }
 0x1cd   :  { %1068 = vsyncpa [#allocation3], 1 }
 0x1ce   :  { %1069 = vsyncpa [#allocation5], 1 }
 0x1cf   :  { %1070 = vsyncpa [#allocation8], 1 }

</bundles_post_ra>
